<compile_context>
chip_gen: v5e
topology: v5e:2x2
jax: 0.10.0
libtpu: 0.0.40
codegen_flags: <defaults>
</compile_context>

<pallas_src>
import jax
import jax.numpy as jnp
from jax.experimental import pallas as pl
from jax.experimental.pallas import tpu as pltpu


def _phi3_mlp_kernel(x_ref, wg_ref, wu_ref, wd_ref, o_ref, acc_ref):
    # x_ref:  (block_m, H)     activation tile
    # wg_ref: (H, tile_i)      gate weight column tile
    # wu_ref: (H, tile_i)      up weight column tile
    # wd_ref: (tile_i, H)      down weight row tile
    # o_ref:  (block_m, H)     output tile (resident across the j axis)
    # acc_ref:(block_m, H) f32 accumulator scratch
    j = pl.program_id(1)

    @pl.when(j == 0)
    def _():
        acc_ref[...] = jnp.zeros_like(acc_ref)

    x = x_ref[...]
    # Independent MXU calls for gate and up (f32 accumulation).
    gate = jnp.dot(x, wg_ref[...], preferred_element_type=jnp.float32)
    up = jnp.dot(x, wu_ref[...], preferred_element_type=jnp.float32)

    # SiLU * up in f32 (VPU/EUP slots, overlapped with MXU work).
    h = up * (gate * jax.nn.sigmoid(gate))

    # Partial down projection for this I-tile, accumulated in f32.
    acc_ref[...] += jnp.dot(h.astype(wd_ref.dtype), wd_ref[...],
                            preferred_element_type=jnp.float32)

    @pl.when(j == pl.num_programs(1) - 1)
    def _():
        o_ref[...] = acc_ref[...].astype(o_ref.dtype)


def _round_up(x, m):
    return ((x + m - 1) // m) * m


def _ceil_div(a, b):
    return (a + b - 1) // b


def _chip_caps():
    """Trace-time TPU generation info: (vmem_capacity, mxu_rows, max_block_m)."""
    kind = ""
    try:
        kind = jax.devices()[0].device_kind.lower()
    except Exception:
        pass

    vmem_cap = None
    try:
        vmem_cap = int(pltpu.get_tpu_info().vmem_capacity_bytes)
    except Exception:
        vmem_cap = None
    if vmem_cap is None or vmem_cap <= 0:
        # Conservative fallbacks: v7x has 64 MiB/TC, older parts 128 MiB.
        vmem_cap = (64 << 20) if "v7" in kind else (128 << 20)

    if "v7" in kind:
        mxu_rows, max_bm = 256, 512      # 64 MiB VMEM -> cap block_m at 512
    elif "v6" in kind:
        mxu_rows, max_bm = 256, 1024     # 128 MiB VMEM, 2x256x256 MXU
    elif "v5" in kind:
        mxu_rows, max_bm = 128, 512      # 4x128x128 MXU, ~0.8 TB/s HBM
    else:
        mxu_rows, max_bm = 128, 512      # unknown: be conservative
    return vmem_cap, mxu_rows, max_bm


def _pick_tile_i(I, cap=512):
    if I % 128 != 0:
        return I                         # small/odd config: use the full dim
    ti = min(I, cap)
    ti = (ti // 128) * 128
    while I % ti != 0:
        ti -= 128
    return ti


def _pick_block_m(M, mxu_rows, max_bm):
    if M <= 16:
        return 16                        # bf16 sublane-pack aligned single tile
    if M <= max_bm:
        # Single (or few) block(s): 16-row alignment, no gratuitous padding.
        return _round_up(M, 16)
    # Multi-block prefill: balance block count, round to MXU row granularity.
    n_blocks = _ceil_div(M, max_bm)
    bm = _round_up(_ceil_div(M, n_blocks), mxu_rows)
    return min(bm, _round_up(max_bm, mxu_rows))


def _vmem_bytes(block_m, tile_i, H, x_bytes, w_bytes):
    return (2 * block_m * H * x_bytes           # x tiles (double-buffered)
            + 2 * 2 * H * tile_i * w_bytes      # gate + up weight tiles
            + 2 * tile_i * H * w_bytes          # down weight tiles
            + 2 * block_m * H * x_bytes         # output tiles
            + block_m * H * 4                   # f32 accumulator
            + 3 * block_m * tile_i * 4)         # gate/up/h f32 temporaries


def phi3_mlp(hidden_states, w_gate_up, w_down, *, block_m=None, tile_i=None):
    """hidden_states: (B, S, H); w_gate_up: (H, 2I); w_down: (I, H).

    Weights are stored (in_features, out_features) -- transposed relative to
    the PyTorch nn.Linear convention -- so the kernel computes x @ W directly.
    """
    B, S, H = hidden_states.shape
    two_I = w_gate_up.shape[1]
    I = two_I // 2
    assert w_gate_up.shape == (H, two_I)
    assert w_down.shape == (I, H)

    M = B * S
    x2d = hidden_states.reshape(M, H)

    vmem_cap, mxu_rows, max_bm = _chip_caps()

    if tile_i is None:
        tile_i = _pick_tile_i(I)
    assert I % tile_i == 0, "tile_i must divide intermediate_size"
    if block_m is None:
        block_m = _pick_block_m(M, mxu_rows, max_bm)

    x_bytes = jnp.dtype(hidden_states.dtype).itemsize
    w_bytes = jnp.dtype(w_gate_up.dtype).itemsize

    # Shrink block_m until the working set fits comfortably in physical VMEM.
    while (_vmem_bytes(block_m, tile_i, H, x_bytes, w_bytes)
           > int(0.8 * vmem_cap) and block_m > 16):
        block_m = max(16, _round_up(block_m // 2, 16))

    # Pad M so the grid tiles evenly; padded rows are zeros and sliced off.
    M_pad = _round_up(M, block_m)
    if M_pad != M:
        x2d = jnp.pad(x2d, ((0, M_pad - M), (0, 0)))

    grid = (M_pad // block_m, I // tile_i)
    n_i_blocks = I // tile_i

    # Fused-weight path: index the (H, 2I) array directly with offset block
    # columns (no HBM slice copies). Requires lane-aligned (128) tile_i.
    fused = (I % 128 == 0) and (tile_i % 128 == 0)
    if fused:
        wg_arg = w_gate_up
        wu_arg = w_gate_up
        wg_spec = pl.BlockSpec((H, tile_i), lambda i, j: (0, j))
        wu_spec = pl.BlockSpec((H, tile_i), lambda i, j: (0, j + n_i_blocks))
    else:
        # Tiny/odd configs only: the slice copy cost is negligible here.
        wg_arg = w_gate_up[:, :I]
        wu_arg = w_gate_up[:, I:]
        wg_spec = pl.BlockSpec((H, tile_i), lambda i, j: (0, j))
        wu_spec = pl.BlockSpec((H, tile_i), lambda i, j: (0, j))

    vmem_bytes = _vmem_bytes(block_m, tile_i, H, x_bytes, w_bytes)
    vmem_limit = int(min(0.9 * vmem_cap, max(32 << 20, vmem_bytes * 1.5)))
    vmem_limit = max(vmem_limit, vmem_bytes)

    # Weights are re-streamed once per M-block (j axis innermost).
    n_m_blocks = M_pad // block_m
    cost = pl.CostEstimate(
        flops=6 * M * H * I,                          # gate + up + down matmuls
        transcendentals=M * I,                        # sigmoid
        bytes_accessed=(2 * M * H * x_bytes
                        + n_m_blocks * 3 * H * I * w_bytes))

    out2d = pl.pallas_call(
        _phi3_mlp_kernel,
        out_shape=jax.ShapeDtypeStruct((M_pad, H), hidden_states.dtype),
        grid_spec=pltpu.PrefetchScalarGridSpec(
            num_scalar_prefetch=0,
            grid=grid,
            in_specs=[
                pl.BlockSpec((block_m, H), lambda i, j: (i, 0)),   # x tile
                wg_spec,                                           # W_gate cols
                wu_spec,                                           # W_up cols
                pl.BlockSpec((tile_i, H), lambda i, j: (j, 0)),    # W_down rows
            ],
            out_specs=pl.BlockSpec((block_m, H), lambda i, j: (i, 0)),
            scratch_shapes=[pltpu.VMEM((block_m, H), jnp.float32)],
        ),
        compiler_params=pltpu.CompilerParams(
            dimension_semantics=("parallel", "arbitrary"),
            vmem_limit_bytes=vmem_limit),
        cost_estimate=cost,
    )(x2d, wg_arg, wu_arg, w_down)

    return out2d[:M].reshape(B, S, H)


def phi3_mlp_ref(hidden_states, w_gate_up, w_down):
    """Pure-JAX reference mirroring the PyTorch forward."""
    I = w_down.shape[0]
    gu = jnp.einsum("bsh,hi->bsi", hidden_states, w_gate_up)
    gate, up = gu[..., :I], gu[..., I:]
    h = up * (gate * jax.nn.sigmoid(gate))
    return jnp.einsum("bsi,ih->bsh", h, w_down)


if __name__ == "__main__":
    key = jax.random.PRNGKey(0)

    # --- Config 1: tiny f32 config (hidden=32, intermediate=64). -------------
    B, S, H, I = 2, 8, 32, 64
    k_x, k_gu, k_d = jax.random.split(key, 3)
    x = jax.random.normal(k_x, (B, S, H), dtype=jnp.float32)
    w_gate_up = jax.random.normal(k_gu, (H, 2 * I), dtype=jnp.float32) * (1.0 / H) ** 0.5
    w_down = jax.random.normal(k_d, (I, H), dtype=jnp.float32) * (1.0 / I) ** 0.5

    out = jax.block_until_ready(phi3_mlp(x, w_gate_up, w_down))
    ref = phi3_mlp_ref(x, w_gate_up, w_down)
    assert out.shape == (B, S, H)
    assert jnp.allclose(out, ref, atol=1e-4, rtol=1e-4), "config1 mismatch"

    # --- Config 2: ragged M (M=5, exercises padding / tail handling). --------
    x2 = jax.random.normal(jax.random.PRNGKey(1), (1, 5, H), dtype=jnp.float32)
    out2 = jax.block_until_ready(phi3_mlp(x2, w_gate_up, w_down))
    ref2 = phi3_mlp_ref(x2, w_gate_up, w_down)
    assert out2.shape == (1, 5, H)
    assert jnp.allclose(out2, ref2, atol=1e-4, rtol=1e-4), "config2 mismatch"

    # --- Config 3: bf16, multi-tile grid over both M and the I reduction,
    # fused (no-slice) weight path with offset index_maps. ---------------------
    B3, S3, H3, I3 = 2, 192, 256, 1024
    k3 = jax.random.split(jax.random.PRNGKey(2), 3)
    x3 = jax.random.normal(k3[0], (B3, S3, H3), dtype=jnp.float32).astype(jnp.bfloat16)
    wgu3 = (jax.random.normal(k3[1], (H3, 2 * I3), dtype=jnp.float32)
            * (1.0 / H3) ** 0.5).astype(jnp.bfloat16)
    wd3 = (jax.random.normal(k3[2], (I3, H3), dtype=jnp.float32)
           * (1.0 / I3) ** 0.5).astype(jnp.bfloat16)

    out3 = jax.block_until_ready(phi3_mlp(x3, wgu3, wd3))
    ref3 = phi3_mlp_ref(x3.astype(jnp.float32), wgu3.astype(jnp.float32),
                        wd3.astype(jnp.float32))
    assert out3.shape == (B3, S3, H3)
    diff = jnp.abs(out3.astype(jnp.float32) - ref3)
    assert bool(jnp.isfinite(diff).all())
    assert float(jnp.max(diff)) < 0.2, f"config3 max err {float(jnp.max(diff))}"
    assert float(jnp.mean(diff)) < 0.02, f"config3 mean err {float(jnp.mean(diff))}"

    # --- Config 4: small multi-M-block grid with explicit tiling override. ----
    x4 = jax.random.normal(jax.random.PRNGKey(3), (4, 64, H3), dtype=jnp.bfloat16)
    out4 = jax.block_until_ready(phi3_mlp(x4, wgu3, wd3, block_m=128, tile_i=256))
    ref4 = phi3_mlp_ref(x4.astype(jnp.float32), wgu3.astype(jnp.float32),
                        wd3.astype(jnp.float32))
    diff4 = jnp.abs(out4.astype(jnp.float32) - ref4)
    assert float(jnp.max(diff4)) < 0.2, f"config4 max err {float(jnp.max(diff4))}"

    print("KERNEL_OK")
</pallas_src>

<mosaic_0001>
module attributes {stable_mosaic.version = 11 : i64} {
  func.func @_phi3_mlp_kernel(%arg0: i32, %arg1: i32, %arg2: memref<16x32xf32, #tpu.memory_space<vmem>>, %arg3: memref<32x64xf32, #tpu.memory_space<vmem>>, %arg4: memref<32x64xf32, #tpu.memory_space<vmem>>, %arg5: memref<64x32xf32, #tpu.memory_space<vmem>>, %arg6: memref<16x32xf32, #tpu.memory_space<vmem>>, %arg7: memref<16x32xf32, #tpu.memory_space<vmem>>) attributes {dimension_semantics = [#tpu.dimension_semantics<parallel>, #tpu.dimension_semantics<arbitrary>], iteration_bounds = array<i64: 1, 1>, scalar_prefetch = 0 : i64, scratch_operands = 1 : i64, tpu.core_type = #tpu.core_type<tc>, window_params = [{transform_indices = @transform_0, window_bounds = array<i64: 16, 32>}, {transform_indices = @transform_1, window_bounds = array<i64: 32, 64>}, {transform_indices = @transform_2, window_bounds = array<i64: 32, 64>}, {transform_indices = @transform_3, window_bounds = array<i64: 64, 32>}, {transform_indices = @transform_4, window_bounds = array<i64: 16, 32>}]} {
    %c0_i32 = arith.constant 0 : i32
    %0 = arith.cmpi eq, %arg1, %c0_i32 : i32
    %1 = arith.extui %0 : i1 to i32
    %c0_i32_0 = arith.constant 0 : i32
    %2 = arith.cmpi ne, %1, %c0_i32_0 : i32
    scf.if %2 {
      %cst_17 = arith.constant 0.000000e+00 : f32
      %23 = vector.broadcast %cst_17 : f32 to vector<16x32xf32>
      %c0_18 = arith.constant 0 : index
      %c0_19 = arith.constant 0 : index
      %24 = vector.load %arg7[%c0_18, %c0_19] : memref<16x32xf32, #tpu.memory_space<vmem>>, vector<16x32xf32>
      tpu.vector_store %arg7[%c0_18, %c0_19], %23 {strides = array<i32>} : memref<16x32xf32, #tpu.memory_space<vmem>>, vector<16x32xf32>,
    } else {
    }
    %c0 = arith.constant 0 : index
    %c0_1 = arith.constant 0 : index
    %3 = vector.load %arg2[%c0, %c0_1] : memref<16x32xf32, #tpu.memory_space<vmem>>, vector<16x32xf32>
    %c0_2 = arith.constant 0 : index
    %c0_3 = arith.constant 0 : index
    %4 = vector.load %arg3[%c0_2, %c0_3] : memref<32x64xf32, #tpu.memory_space<vmem>>, vector<32x64xf32>
    %cst = arith.constant dense<0.000000e+00> : vector<16x64xf32>
    %5 = tpu.matmul %3, %4, %cst {dimension_numbers = #tpu.dot_dimension_numbers<[1], [0], [0], [1], [0, 0, 1, 1], [], []>} : vector<16x32xf32>, vector<32x64xf32>, vector<16x64xf32> -> vector<16x64xf32>
    %c0_4 = arith.constant 0 : index
    %c0_5 = arith.constant 0 : index
    %6 = vector.load %arg4[%c0_4, %c0_5] : memref<32x64xf32, #tpu.memory_space<vmem>>, vector<32x64xf32>
    %cst_6 = arith.constant dense<0.000000e+00> : vector<16x64xf32>
    %7 = tpu.matmul %3, %6, %cst_6 {dimension_numbers = #tpu.dot_dimension_numbers<[1], [0], [0], [1], [0, 0, 1, 1], [], []>} : vector<16x32xf32>, vector<32x64xf32>, vector<16x64xf32> -> vector<16x64xf32>
    %8 = arith.negf %5 : vector<16x64xf32>
    %9 = math.exp %8 : vector<16x64xf32>
    %cst_7 = arith.constant 1.000000e+00 : f32
    %10 = vector.broadcast %cst_7 : f32 to vector<16x64xf32>
    %11 = arith.addf %10, %9 : vector<16x64xf32>
    %12 = arith.divf %10, %11 : vector<16x64xf32>
    %13 = arith.mulf %5, %12 : vector<16x64xf32>
    %14 = arith.mulf %7, %13 : vector<16x64xf32>
    %c0_8 = arith.constant 0 : index
    %c0_9 = arith.constant 0 : index
    %15 = vector.load %arg7[%c0_8, %c0_9] : memref<16x32xf32, #tpu.memory_space<vmem>>, vector<16x32xf32>
    %c0_10 = arith.constant 0 : index
    %c0_11 = arith.constant 0 : index
    %16 = vector.load %arg5[%c0_10, %c0_11] : memref<64x32xf32, #tpu.memory_space<vmem>>, vector<64x32xf32>
    %cst_12 = arith.constant dense<0.000000e+00> : vector<16x32xf32>
    %17 = tpu.matmul %14, %16, %cst_12 {dimension_numbers = #tpu.dot_dimension_numbers<[1], [0], [0], [1], [0, 0, 1, 1], [], []>} : vector<16x64xf32>, vector<64x32xf32>, vector<16x32xf32> -> vector<16x32xf32>
    %18 = arith.addf %15, %17 : vector<16x32xf32>
    %c0_13 = arith.constant 0 : index
    %c0_14 = arith.constant 0 : index
    %19 = vector.load %arg7[%c0_13, %c0_14] : memref<16x32xf32, #tpu.memory_space<vmem>>, vector<16x32xf32>
    tpu.vector_store %arg7[%c0_13, %c0_14], %18 {strides = array<i32>} : memref<16x32xf32, #tpu.memory_space<vmem>>, vector<16x32xf32>,
    %c0_i32_15 = arith.constant 0 : i32
    %20 = arith.cmpi eq, %arg1, %c0_i32_15 : i32
    %21 = arith.extui %20 : i1 to i32
    %c0_i32_16 = arith.constant 0 : i32
    %22 = arith.cmpi ne, %21, %c0_i32_16 : i32
    scf.if %22 {
      %c0_17 = arith.constant 0 : index
      %c0_18 = arith.constant 0 : index
      %23 = vector.load %arg7[%c0_17, %c0_18] : memref<16x32xf32, #tpu.memory_space<vmem>>, vector<16x32xf32>
      %c0_19 = arith.constant 0 : index
      %c0_20 = arith.constant 0 : index
      %24 = vector.load %arg6[%c0_19, %c0_20] : memref<16x32xf32, #tpu.memory_space<vmem>>, vector<16x32xf32>
      tpu.vector_store %arg6[%c0_19, %c0_20], %23 {strides = array<i32>} : memref<16x32xf32, #tpu.memory_space<vmem>>, vector<16x32xf32>,
    } else {
    }
    return
  }
  func.func @transform_0(%arg0: i32, %arg1: i32) -> (i32, i32) {
    %c0_i32 = arith.constant 0 : i32
    %c0_i32_0 = arith.constant 0 : i32
    return %arg0, %c0_i32 : i32, i32
  }
  func.func @transform_1(%arg0: i32, %arg1: i32) -> (i32, i32) {
    %c0_i32 = arith.constant 0 : i32
    %c0_i32_0 = arith.constant 0 : i32
    return %c0_i32, %arg1 : i32, i32
  }
  func.func @transform_2(%arg0: i32, %arg1: i32) -> (i32, i32) {
    %c0_i32 = arith.constant 0 : i32
    %c0_i32_0 = arith.constant 0 : i32
    return %c0_i32, %arg1 : i32, i32
  }
  func.func @transform_3(%arg0: i32, %arg1: i32) -> (i32, i32) {
    %c0_i32 = arith.constant 0 : i32
    %c0_i32_0 = arith.constant 0 : i32
    return %arg1, %c0_i32 : i32, i32
  }
  func.func @transform_4(%arg0: i32, %arg1: i32) -> (i32, i32) {
    %c0_i32 = arith.constant 0 : i32
    %c0_i32_0 = arith.constant 0 : i32
    return %arg0, %c0_i32 : i32, i32
  }
}

</mosaic_0001>

<bundles_post_ra>
// kernel: tpu_custom_call.1
= control target key start
LH: loop header
LB: loop body
LE: loop exit
PB: predicated region body
PF: predicated region fallthrough
CT: control target
= control target key end

     0   :  { %s351_s0 = inlined_call_operand.vmem [shape: f32[16,32], index: 0, kind: input, shape index: {}]   ;;  %s352_s1 = inlined_call_operand.vmem [shape: f32[32,64], index: 1, kind: input, shape index: {}]   ;;  %s353_s2 = inlined_call_operand.vmem [shape: f32[32,64], index: 2, kind: input, shape index: {}]   ;;  %s354_s3 = inlined_call_operand.vmem [shape: f32[64,32], index: 3, kind: input, shape index: {}]   ;;  %s355_s4 = inlined_call_operand.hbm [shape: f32[16,32], index: 4, kind: output, shape index: {}]  }
   0x1   :  { %v30_v0 = vld [vmem:[%s352_s1 + $0x18] sm:$0xff]  ;;  %v29_v1 = vld [vmem:[%s352_s1 + $0x10] sm:$0xff]  ;;  %v28_v2 = vld [vmem:[%s352_s1 + $0x8] sm:$0xff] }
   0x2   :  { %50 = vmatpush.msra.mxu0 %v30_v0  ;;  %v64_v3 = vld [vmem:[%s353_s2 + $0x18] sm:$0xff]  ;;  %v63_v4 = vld [vmem:[%s353_s2 + $0x10] sm:$0xff] }
   0x3   :  { %77 = vmatpush.msra.mxu1 %v64_v3 }
   0x4   :  { %51 = vmatpush.msra.mxu0 %v29_v1 }
   0x5   :  { %9 = vsyncpa [#allocation4], 0  ;;  %v27_v5 = vld [vmem:[%s352_s1] sm:$0xff]  ;;  %v62_v6 = vld [vmem:[%s353_s2 + $0x8] sm:$0xff]  ;;  %vm22_vm0 = vcmask 261120   ;;  %78 = vmatpush.msra.mxu1 %v63_v4  ;;  %v253_v24 = vmov 0.0  }
   0x6   :  { %52 = vmatpush.msra.mxu0 %v28_v2  ;;  %v25_v7 = vld [vmem:[%s351_s0] sm:$0xff]  ;;  %v26_v9 = vld [vmem:[%s351_s0 + $0x8] sm:$0xff]  ;;  %v139_v10 = vld [vmem:[%s354_s3 + $0x38] sm:$0xff]  ;;  %23 = vst.msk [vmem:[#allocation2] sm:$0xff] %vm22_vm0, %v253_v24  ;;  %vm140_vm5 = vcmask 523264   ;;  %s187_s25 = sshll.u32 %s355_s4, 4  ;;  %s188_s25 = int_to_ptr.hbm [resolvable:$true] %s187_s25 }
   0x7   :  { %v61_v8 = vld [vmem:[%s353_s2] sm:$0xff]  ;;  %79 = vmatpush.msra.mxu1 %v62_v6  ;;  %155 = vmatpush.msra.mxu2 %v139_v10  ;;  %v138_v11 = vld [vmem:[%s354_s3 + $0x30] sm:$0xff]  ;;  %v137_v12 = vld [vmem:[%s354_s3 + $0x28] sm:$0xff]  ;;  %24 = vst.msk [vmem:[#allocation2 + $0x8] sm:$0xff] %vm22_vm0, %v253_v24  ;;  %s255_s26 = smov 128   ;;  %s256_s27 = smov 8  }
   0x8   :  { %53 = vmatpush.msra.mxu0 %v27_v5  ;;  %207 = vmatpush.msra.mxu3 %v139_v10  ;;  %v136_v13 = vld [vmem:[%s354_s3 + $0x20] sm:$0xff]  ;;  %v135_v14 = vld [vmem:[%s354_s3 + $0x18] sm:$0xff]  ;;  %v134_v15 = vld [vmem:[%s354_s3 + $0x10] sm:$0xff] }
   0x9   :  { %199 = vmatmul.msk.f32.vlgmr.msra.gmra.mxu0 %vm22_vm0, %v25_v7  ;;  %80 = vmatpush.msra.mxu1 %v61_v8  ;;  %v133_v16 = vld [vmem:[%s354_s3 + $0x8] sm:$0xff]  ;;  %v132_v17 = vld [vmem:[%s354_s3] sm:$0xff]  ;;  %s254_s3 = smov [#allocation3]  }
   0xa   :  { %201 = vmatmul.msk.f32.vlgmr.msra.gmra.mxu1 %vm22_vm0, %v25_v7  ;;  %156 = vmatpush.msra.mxu2 %v138_v11  ;;  %s185_s22 = sshll.u32 %s254_s3, 4  ;;  %s186_s22 = int_to_ptr.vmem [resolvable:$true] %s185_s22 }
   0xb   :  { %208 = vmatpush.msra.mxu3 %v138_v11 }
   0xc   :  { %157 = vmatpush.msra.mxu2 %v137_v12 }
   0xd   :  { %209 = vmatpush.msra.mxu3 %v137_v12  ;;  %v130_v53 = vld [vmem:[#allocation2] sm:$0xff] }
   0xe   :  { %158 = vmatpush.msra.mxu2 %v136_v13  ;;  %v131_v56 = vld [vmem:[#allocation2 + $0x8] sm:$0xff] }
   0xf   :  { %210 = vmatpush.msra.mxu3 %v136_v13 }
  0x10   :  { %159 = vmatpush.msra.mxu2 %v135_v14 }
  0x11   :  { %200 = vmatmul.msk.f32.gmra.mxu0 %vm22_vm0, %v26_v9  ;;  %211 = vmatpush.msra.mxu3 %v135_v14 }
  0x12   :  { %202 = vmatmul.msk.f32.gmra.mxu1 %vm22_vm0, %v26_v9  ;;  %160 = vmatpush.msra.mxu2 %v134_v15 }
  0x13   :  { %212 = vmatpush.msra.mxu3 %v134_v15 }
  0x14   :  { %161 = vmatpush.msra.mxu2 %v133_v16 }
  0x15   :  { %213 = vmatpush.msra.mxu3 %v133_v16 }
  0x16   :  { %162 = vmatpush.msra.mxu2 %v132_v17 }
  0x17   :  { %214 = vmatpush.msra.mxu3 %v132_v17 }
  0x86   :  { %v55_v18 = vpop.f32.mrf.mxu0 }
  0x87   :  { %v203_v19 = vmul.f32 -1.442695, %v55_v18  ;;  %v82_v36 = vpop.f32.mrf.mxu1 }
  0x89   :  { %219 = vpow2.f32 %v203_v19 }
  0x8e   :  { %v58_v20 = vpop.f32.mrf.mxu0 }
  0x8f   :  { %v220_v21 = vpop.eup %219  ;;  %v204_v22 = vmul.f32 -1.442695, %v58_v20  ;;  %v85_v50 = vpop.f32.mrf.mxu1 }
  0x90   :  { %v94_v23 = vadd.f32 1.0, %v220_v21 }
  0x91   :  { %221 = vpow2.f32 %v204_v22 }
  0x92   :  { %223 = vrcp.f32 %v94_v23  ;;  %v107_v30 = vand.u32 2147483648, %v94_v23  ;;  %v105_v32 = vand.u32 2147483647, %v94_v23  ;;  %vm101_vm2 = vweird.f32 %v94_v23 }
  0x94   :  { %v108_v35 = vor.u32 1.1754944e-38, %v107_v30  ;;  %vm106_vm4 = vcmp.eq.f32.partialorder %v105_v32, 8.507059e+37 }
  0x97   :  { %v222_v25 = vpop.eup %221 }
  0x98   :  { %v224_v26 = vpop.eup %223  ;;  %v95_v27 = vadd.f32 1.0, %v222_v25 }
  0x99   :  { %v97_v28 = vmul.f32 %v224_v26, %v94_v23  ;;  %vm102_vm1 = vweird.f32 %v224_v26 }
  0x9a   :  { %225 = vrcp.f32 %v95_v27  ;;  %vm103_vm3 = vmor %vm101_vm2, %vm102_vm1  ;;  %v122_v42 = vand.u32 2147483648, %v95_v27  ;;  %v120_v44 = vand.u32 2147483647, %v95_v27  ;;  %vm116_vm7 = vweird.f32 %v95_v27 }
  0x9b   :  { %v98_v29 = vsub.f32 1.0, %v97_v28 }
  0x9c   :  { %v123_v47 = vor.u32 1.1754944e-38, %v122_v42  ;;  %vm121_vm9 = vcmp.eq.f32.partialorder %v120_v44, 8.507059e+37 }
  0x9d   :  { %v99_v31 = vmul.f32 %v224_v26, %v98_v29 }
  0x9f   :  { %v100_v33 = vadd.f32 %v224_v26, %v99_v31 }
  0xa0   :  { %v226_v34 = vpop.eup %225 }
  0xa1   :  { %v104_v37 = vsel %vm103_vm3, %v224_v26, %v100_v33  ;;  %v112_v38 = vmul.f32 %v226_v34, %v95_v27  ;;  %vm117_vm6 = vweird.f32 %v226_v34 }
  0xa2   :  { %v109_v39 = vsel %vm106_vm4, %v108_v35, %v104_v37  ;;  %vm118_vm8 = vmor %vm116_vm7, %vm117_vm6 }
  0xa3   :  { %v126_v40 = vmul.f32 %v109_v39, %v55_v18  ;;  %v113_v41 = vsub.f32 1.0, %v112_v38 }
  0xa5   :  { %v114_v43 = vmul.f32 %v226_v34, %v113_v41  ;;  %v128_v45 = vmul.f32 %v126_v40, %v82_v36 }
  0xa7   :  { %v115_v46 = vadd.f32 %v226_v34, %v114_v43  ;;  %205 = vmatmul.msk.f32.vlgmr.msra.gmra.mxu2 %vm140_vm5, %v128_v45 }
  0xa9   :  { %v119_v48 = vsel %vm118_vm8, %v226_v34, %v115_v46 }
  0xaa   :  { %v124_v49 = vsel %vm121_vm9, %v123_v47, %v119_v48 }
  0xab   :  { %v127_v51 = vmul.f32 %v124_v49, %v58_v20 }
  0xad   :  { %v129_v52 = vmul.f32 %v127_v51, %v85_v50 }
  0xaf   :  { %206 = vmatmul.msk.f32.vlgmr.msra.gmra.mxu3 %vm140_vm5, %v129_v52 }
 0x12a   :  { %v164_v54 = vpop.f32.mrf.mxu2 }
 0x12b   :  { %v170_v55 = vadd.f32 %v164_v54, %v130_v53 }
 0x12d   :  { %172 = vst.msk [vmem:[#allocation2] sm:$0xff] %vm22_vm0, %v170_v55 }
 0x132   :  { %v167_v57 = vpop.f32.mrf.mxu3 }
 0x133   :  { %v171_v58 = vadd.f32 %v167_v57, %v131_v56 }
 0x134   :  { %v177_v59 = vld [vmem:[#allocation2] sm:$0xff] }
 0x135   :  { %173 = vst.msk [vmem:[#allocation2 + $0x8] sm:$0xff] %vm22_vm0, %v171_v58 }
 0x136   :  { %179 = vst.msk [vmem:[#allocation3] sm:$0xff] %vm22_vm0, %v177_v59 }
 0x13c   :  { %v178_v60 = vld [vmem:[#allocation2 + $0x8] sm:$0xff] }
 0x13d   :  { %180 = vst.msk [vmem:[#allocation3 + $0x8] sm:$0xff] %vm22_vm0, %v178_v60 }
 0x13e   :  { %193 = dma.vmem_to_hbm [thread:$0]  %s186_s22, 256, %s188_s25, [#allocation4], %s255_s26, %s255_s26, %s256_s27  }
 0x13f   :  { %251 = dma.done.wait [#allocation4], 256  }
 0x140   :  { %252 = vsyncadd [#allocation4], 4294967040 }
 0x141   :  { %198 = vsyncpa [#allocation4], 1 }

</bundles_post_ra>
